<compile_context>
chip_gen: v6e
topology: v6e:2x2x1
jax: 0.10.0
libtpu: 0.0.40
codegen_flags: <defaults>
</compile_context>

<pallas_src>
import jax
import jax.numpy as jnp
from jax import lax
from jax.experimental import pallas as pl
from jax.experimental.pallas import tpu as pltpu


# ----------------------------------------------------------------------------
# VMEM limit helper (re-derived per generation instead of a fixed 48 MiB)
# ----------------------------------------------------------------------------
def _vmem_limit_bytes(block_bytes):
    try:
        cap = pltpu.get_tpu_info().vmem_capacity_bytes
    except Exception:
        cap = 64 * 1024 * 1024          # conservative: v7x per-core VMEM
    lo = 32 * 1024 * 1024
    hi = max(lo, cap - 16 * 1024 * 1024)  # leave headroom for compiler scratch
    return int(min(max(int(block_bytes), lo), hi))


# ----------------------------------------------------------------------------
# Kernel 1: per-head query-mean of softmax(logits / T)   ->  (B, H, S)
# ----------------------------------------------------------------------------
def _mean_scores_kernel(u_ref, mmat_ref, key_ref, ms_ref):
    # u_ref   : (H*Q, D) bf16  fused (Wk_h^T Wq q / T) rows, batch-invariant
    # mmat_ref: (H, H*Q) f32   block-diagonal 1/Q averaging matrix
    # key_ref : (1, S, D) f32  this batch element's flattened key (cast here)
    # ms_ref  : (1, H, S) f32  mean over Q of softmax(logits / T) per head
    key_bf = key_ref[0].astype(jnp.bfloat16)                       # in-kernel cast
    # logits[h*Q+q, s] = <U[hq,:], key[s,:]>  -> one MXU matmul, K = d_model
    logits = lax.dot_general(u_ref[...], key_bf,
                             (((1,), (1,)), ((), ())),
                             preferred_element_type=jnp.float32)    # (HQ, S)
    m = jnp.max(logits, axis=-1, keepdims=True)
    e = jnp.exp(logits - m)
    s = jnp.sum(e, axis=-1, keepdims=True)
    attn = e * pl.reciprocal(s, approx=False)                       # f32 softmax over S
    # mean over Q folded into a tiny f32 matmul -> one lane-dense (H, S) store
    ms_ref[0] = jnp.dot(mmat_ref[...], attn,
                        preferred_element_type=jnp.float32)


def mean_attention_scores_pallas(query_eff, wq_t, wk_t, key, *,
                                 num_heads, temperature):
    bsz, seq_len, n_heads, head_dim = key.shape
    assert n_heads == num_heads
    d_model = num_heads * head_dim
    q_len, d_query = query_eff.shape
    d_qh = d_query // num_heads
    hq = num_heads * q_len

    # ---- batch-invariant precompute, hoisted out of the per-batch grid ----
    # logits[h,q,s] = <Wq q / T, Wk_h k_s> = <U[h,q,:], key[s,:]>
    pq = (query_eff.astype(jnp.float32) @ wq_t.astype(jnp.float32)) / float(temperature)
    pq_h = pq.reshape(q_len, num_heads, d_qh).transpose(1, 0, 2)          # (H, Q, d_qh)
    wk_h = wk_t.astype(jnp.float32).reshape(d_model, num_heads, d_qh)     # (D, H, d_qh)
    u = jnp.einsum('hqd,Dhd->hqD', pq_h, wk_h).reshape(hq, d_model)       # (HQ, D)
    u = u.astype(jnp.bfloat16)

    head_of_row = jnp.repeat(jnp.arange(num_heads, dtype=jnp.int32), q_len)
    mean_mat = (jax.nn.one_hot(head_of_row, num_heads, dtype=jnp.float32)
                / float(q_len)).T                                          # (H, HQ)

    key_flat = key.reshape(bsz, seq_len, d_model)   # free reshape; bf16 cast in-kernel

    block_bytes = (2 * seq_len * d_model * 4        # double-buffered f32 key block
                   + 2 * num_heads * seq_len * 4    # double-buffered f32 out block
                   + 2 * hq * d_model * 2           # U (bf16)
                   + 2 * num_heads * hq * 4         # mean matrix
                   + (4 << 20))                     # logits/exp intermediates headroom

    # TODO(synk): for very long S (whole-S key block too large for v7x's 64 MiB
    # VMEM) add an S grid axis with a two-pass / online-softmax Q-mean; for tiny
    # bsz add a second "parallel" axis (heads) so both v7x TensorCores are used,
    # and on v5e/v6e batch Bt>1 elements per grid step to amortize step overhead.
    return pl.pallas_call(
        _mean_scores_kernel,
        out_shape=jax.ShapeDtypeStruct((bsz, num_heads, seq_len), jnp.float32),
        grid_spec=pltpu.PrefetchScalarGridSpec(
            num_scalar_prefetch=0,
            grid=(bsz,),
            in_specs=[
                pl.BlockSpec((hq, d_model), lambda b: (0, 0)),
                pl.BlockSpec((num_heads, hq), lambda b: (0, 0)),
                pl.BlockSpec((1, seq_len, d_model), lambda b: (b, 0, 0)),
            ],
            out_specs=pl.BlockSpec((1, num_heads, seq_len), lambda b: (b, 0, 0)),
        ),
        compiler_params=pltpu.CompilerParams(
            dimension_semantics=("parallel",),
            vmem_limit_bytes=_vmem_limit_bytes(block_bytes)),
    )(u, mean_mat, key_flat)


# ----------------------------------------------------------------------------
# Kernel 2: gather selected tokens along the sequence axis
#   - batch-strided HBM -> HBM DMAs, one per (token, stream), covering all B rows
#   - DMA directly into the ANY-space outputs (no VMEM staging)
#   - bounded DMA-semaphore ring
# ----------------------------------------------------------------------------
_GATHER_RING = 8   # power of two


def _gather_kernel(idx_ref, k_hbm, v_hbm, ko_hbm, vo_hbm, sems):
    # idx_ref       : (T,) int32 sorted token indices (SMEM, scalar prefetch)
    # k_hbm/v_hbm   : (B, S, D)  inputs left in HBM (memory_space=pl.ANY)
    # ko_hbm/vo_hbm : (B, T, D)  outputs left in HBM (memory_space=pl.ANY)
    # sems          : (2, RING)  DMA semaphore ring
    t_len = ko_hbm.shape[1]
    ring = sems.shape[1]

    def k_copy(t, i, slot):
        return pltpu.make_async_copy(k_hbm.at[:, pl.ds(i, 1)],
                                     ko_hbm.at[:, pl.ds(t, 1)], sems.at[0, slot])

    def v_copy(t, i, slot):
        return pltpu.make_async_copy(v_hbm.at[:, pl.ds(i, 1)],
                                     vo_hbm.at[:, pl.ds(t, 1)], sems.at[1, slot])

    @pl.loop(0, t_len)
    def _issue(t):
        slot = t & (ring - 1)

        # Before reusing a ring slot, wait on the copy that previously used it
        # (reconstructed with its true src/dst, not a dummy slice).
        @pl.when(t >= ring)
        def _():
            tp = t - ring
            ip = idx_ref[tp]
            k_copy(tp, ip, slot).wait()
            v_copy(tp, ip, slot).wait()

        i = idx_ref[t]
        k_copy(t, i, slot).start()
        v_copy(t, i, slot).start()

    drain = min(t_len, ring)

    @pl.loop(t_len - drain, t_len)
    def _drain(t):
        slot = t & (ring - 1)
        i = idx_ref[t]
        k_copy(t, i, slot).wait()
        v_copy(t, i, slot).wait()


def gather_tokens_pallas(key, value, sorted_indices):
    bsz, seq_len, num_heads, head_dim = key.shape
    d = num_heads * head_dim
    target_len = int(sorted_indices.shape[0])

    key_flat = key.reshape(bsz, seq_len, d)      # free reshapes (row-major)
    val_flat = value.reshape(bsz, seq_len, d)

    sel_k, sel_v = pl.pallas_call(
        _gather_kernel,
        out_shape=(
            jax.ShapeDtypeStruct((bsz, target_len, d), key.dtype),
            jax.ShapeDtypeStruct((bsz, target_len, d), value.dtype),
        ),
        grid_spec=pltpu.PrefetchScalarGridSpec(
            num_scalar_prefetch=1,
            grid=(1,),
            in_specs=[
                pl.BlockSpec(memory_space=pl.ANY),
                pl.BlockSpec(memory_space=pl.ANY),
            ],
            out_specs=(
                pl.BlockSpec(memory_space=pl.ANY),
                pl.BlockSpec(memory_space=pl.ANY),
            ),
            scratch_shapes=[
                pltpu.SemaphoreType.DMA((2, _GATHER_RING)),
            ],
        ),
        compiler_params=pltpu.CompilerParams(
            dimension_semantics=("arbitrary",),
            has_side_effects=True),
    )(sorted_indices, key_flat, val_flat)

    return (sel_k.reshape(bsz, target_len, num_heads, head_dim),
            sel_v.reshape(bsz, target_len, num_heads, head_dim))


# ----------------------------------------------------------------------------
# Module-level wrapper (glue in plain JAX)
# ----------------------------------------------------------------------------
def init_perceiver_pruner_params(rng, query_len, d_query, d_model):
    k1, k2, k3 = jax.random.split(rng, 3)
    return {
        # nn.Parameter(torch.randn(query_len, d_query))
        "query": jax.random.normal(k1, (query_len, d_query), dtype=jnp.float32),
        # nn.Linear weights are (out, in); store transposed so proj = x @ W_t
        "wq_t": jax.random.normal(k2, (d_query, d_query), dtype=jnp.float32).T,
        "wk_t": jax.random.normal(k3, (d_query, d_model), dtype=jnp.float32).T,
    }


def perceiver_pruner_forward(params, key, value, attention, target_len, *,
                             query_len, compressed_chunk_size, chunk_size,
                             temperature, indices_rng, training=False):
    bsz, seq_len, num_heads, head_dim = key.shape

    # ---- get_attention_scores: only the Q-mean (B, H, S) is consumed downstream,
    #      so the full (B, H, Q, S) attention tensor is never materialized. ----
    if compressed_chunk_size < query_len and not training:
        q_eff = params["query"][:compressed_chunk_size]
    else:
        q_eff = params["query"]
    model_scores = mean_attention_scores_pallas(
        q_eff, params["wq_t"], params["wk_t"], key,
        num_heads=num_heads, temperature=temperature)          # (B, H, S)

    # ---- get_random_indices (host random.sample -> deterministic jax.random
    #      subset), then sort; topk_probs is None on this path so no
    #      straight-through scaling of selected_keys. ----
    token_indices = jax.random.permutation(indices_rng, seq_len)[:target_len]
    sorted_indices = jnp.sort(token_indices).astype(jnp.int32)

    # ---- torch.gather(key/value, dim=1, ...) as a batch-strided DMA gather ----
    selected_keys, selected_values = gather_tokens_pallas(key, value, sorted_indices)

    # ---- auxiliary MSE loss (stored as self.mse_loss in the torch module) ----
    if attention is not None:
        target_scores = jnp.mean(attention[:, :, -chunk_size:, :], axis=2)
        kv_len = attention.shape[-1]
        mse_loss = jnp.mean((kv_len * (target_scores - model_scores)) ** 2)
    else:
        mse_loss = None

    return selected_keys, selected_values, mse_loss


if __name__ == "__main__":
    # Small, module-consistent shapes.
    bsz, seq_len, num_heads, head_dim = 2, 16, 4, 8
    d_model = num_heads * head_dim          # 32
    d_query = 32                            # divisible by num_heads
    query_len = 8
    compressed_chunk_size = 4               # < query_len -> eval-mode slice
    chunk_size = 4
    temperature = 2.0
    target_len = 8

    root = jax.random.PRNGKey(0)
    k_param, k_key, k_val, k_attn, k_idx = jax.random.split(root, 5)

    params = init_perceiver_pruner_params(k_param, query_len, d_query, d_model)
    key = jax.random.normal(k_key, (bsz, seq_len, num_heads, head_dim), dtype=jnp.float32)
    value = jax.random.normal(k_val, (bsz, seq_len, num_heads, head_dim), dtype=jnp.float32)
    # "real" attention over the memory: (B, H, q_chunk, S), softmaxed over S
    attention = jax.nn.softmax(
        jax.random.normal(k_attn, (bsz, num_heads, 8, seq_len), dtype=jnp.float32), axis=-1)

    sel_k, sel_v, mse = perceiver_pruner_forward(
        params, key, value, attention, target_len,
        query_len=query_len, compressed_chunk_size=compressed_chunk_size,
        chunk_size=chunk_size, temperature=temperature, indices_rng=k_idx)

    jax.block_until_ready((sel_k, sel_v, mse))

    assert sel_k.shape == (bsz, target_len, num_heads, head_dim)
    assert sel_v.shape == (bsz, target_len, num_heads, head_dim)
    assert mse.shape == ()
    assert bool(jnp.isfinite(mse))

    # The gather is pure data movement -> check exactly against jnp.take.
    token_indices = jax.random.permutation(k_idx, seq_len)[:target_len]
    sorted_indices = jnp.sort(token_indices).astype(jnp.int32)
    assert bool(jnp.array_equal(sel_k, jnp.take(key, sorted_indices, axis=1)))
    assert bool(jnp.array_equal(sel_v, jnp.take(value, sorted_indices, axis=1)))

    print("KERNEL_OK")
</pallas_src>

<mosaic_0001>
module attributes {stable_mosaic.version = 11 : i64} {
  func.func @_mean_scores_kernel(%arg0: i32, %arg1: memref<16x32xbf16, #tpu.memory_space<vmem>>, %arg2: memref<4x16xf32, #tpu.memory_space<vmem>>, %arg3: memref<1x16x32xf32, #tpu.memory_space<vmem>>, %arg4: memref<1x4x16xf32, #tpu.memory_space<vmem>>) attributes {dimension_semantics = [#tpu.dimension_semantics<parallel>], iteration_bounds = array<i64: 2>, scalar_prefetch = 0 : i64, scratch_operands = 0 : i64, tpu.core_type = #tpu.core_type<tc>, window_params = [{pipeline_mode = #tpu.pipeline_mode<synchronous>, transform_indices = @transform_0, window_bounds = array<i64: 16, 32>}, {pipeline_mode = #tpu.pipeline_mode<synchronous>, transform_indices = @transform_1, window_bounds = array<i64: 4, 16>}, {transform_indices = @transform_2, window_bounds = array<i64: 1, 16, 32>}, {transform_indices = @transform_3, window_bounds = array<i64: 1, 4, 16>}]} {
    %c0 = arith.constant 0 : index
    %c0_0 = arith.constant 0 : index
    %c0_1 = arith.constant 0 : index
    %0 = vector.load %arg3[%c0, %c0_0, %c0_1] : memref<1x16x32xf32, #tpu.memory_space<vmem>>, vector<1x16x32xf32>
    %1 = vector.shape_cast %0 : vector<1x16x32xf32> to vector<16x32xf32>
    %2 = arith.truncf %1 : vector<16x32xf32> to vector<16x32xbf16>
    %c0_2 = arith.constant 0 : index
    %c0_3 = arith.constant 0 : index
    %3 = vector.load %arg1[%c0_2, %c0_3] : memref<16x32xbf16, #tpu.memory_space<vmem>>, vector<16x32xbf16>
    %cst = arith.constant dense<0.000000e+00> : vector<16x16xf32>
    %4 = tpu.matmul %3, %2, %cst {dimension_numbers = #tpu.dot_dimension_numbers<[1], [1], [0], [0], [0, 0, 1, 0], [], []>} : vector<16x32xbf16>, vector<16x32xbf16>, vector<16x16xf32> -> vector<16x16xf32>
    %cst_4 = arith.constant dense<0xFF800000> : vector<16xf32>
    %5 = vector.multi_reduction <maximumf>, %4, %cst_4 [1] : vector<16x16xf32> to vector<16xf32>
    %6 = vector.shape_cast %5 : vector<16xf32> to vector<16x1xf32>
    %7 = vector.broadcast %6 : vector<16x1xf32> to vector<16x16xf32>
    %8 = arith.subf %4, %7 : vector<16x16xf32>
    %9 = math.exp %8 : vector<16x16xf32>
    %cst_5 = arith.constant dense<0.000000e+00> : vector<16xf32>
    %10 = vector.multi_reduction <add>, %9, %cst_5 [1] : vector<16x16xf32> to vector<16xf32>
    %11 = vector.shape_cast %10 : vector<16xf32> to vector<16x1xf32>
    %12 = tpu.reciprocal %11 : vector<16x1xf32> -> vector<16x1xf32>
    %13 = vector.broadcast %12 : vector<16x1xf32> to vector<16x16xf32>
    %14 = arith.mulf %9, %13 : vector<16x16xf32>
    %c0_6 = arith.constant 0 : index
    %c0_7 = arith.constant 0 : index
    %15 = vector.load %arg2[%c0_6, %c0_7] : memref<4x16xf32, #tpu.memory_space<vmem>>, vector<4x16xf32>
    %cst_8 = arith.constant dense<0.000000e+00> : vector<4x16xf32>
    %16 = tpu.matmul %15, %14, %cst_8 {dimension_numbers = #tpu.dot_dimension_numbers<[1], [0], [0], [1], [0, 0, 1, 1], [], []>} : vector<4x16xf32>, vector<16x16xf32>, vector<4x16xf32> -> vector<4x16xf32>
    %c0_9 = arith.constant 0 : index
    %c0_10 = arith.constant 0 : index
    %c0_11 = arith.constant 0 : index
    %17 = vector.load %arg4[%c0_9, %c0_10, %c0_11] : memref<1x4x16xf32, #tpu.memory_space<vmem>>, vector<1x4x16xf32>
    %18 = vector.shape_cast %17 : vector<1x4x16xf32> to vector<4x16xf32>
    %19 = vector.shape_cast %16 : vector<4x16xf32> to vector<1x4x16xf32>
    tpu.vector_store %arg4[%c0_9, %c0_10, %c0_11], %19 {strides = array<i32>} : memref<1x4x16xf32, #tpu.memory_space<vmem>>, vector<1x4x16xf32>,
    return
  }
  func.func @transform_0(%arg0: i32) -> (i32, i32) {
    %c0_i32 = arith.constant 0 : i32
    %c0_i32_0 = arith.constant 0 : i32
    %c0_i32_1 = arith.constant 0 : i32
    return %c0_i32, %c0_i32_0 : i32, i32
  }
  func.func @transform_1(%arg0: i32) -> (i32, i32) {
    %c0_i32 = arith.constant 0 : i32
    %c0_i32_0 = arith.constant 0 : i32
    %c0_i32_1 = arith.constant 0 : i32
    return %c0_i32, %c0_i32_0 : i32, i32
  }
  func.func @transform_2(%arg0: i32) -> (i32, i32, i32) {
    %c0_i32 = arith.constant 0 : i32
    %c0_i32_0 = arith.constant 0 : i32
    %c0_i32_1 = arith.constant 0 : i32
    return %arg0, %c0_i32, %c0_i32_0 : i32, i32, i32
  }
  func.func @transform_3(%arg0: i32) -> (i32, i32, i32) {
    %c0_i32 = arith.constant 0 : i32
    %c0_i32_0 = arith.constant 0 : i32
    %c0_i32_1 = arith.constant 0 : i32
    return %arg0, %c0_i32, %c0_i32_0 : i32, i32, i32
  }
}

</mosaic_0001>

<bundles_post_ra>
// kernel: tpu_custom_call.1
= control target key start
LH: loop header
LB: loop body
LE: loop exit
PB: predicated region body
PF: predicated region fallthrough
CT: control target
= control target key end

     0   :  { %8 = vsyncpa [#allocation3], 0  ;;  %s983_s0 = inlined_call_operand.hbm [shape: bf16[16,32], index: 0, kind: input, shape index: {}]   ;;  %s984_s1 = inlined_call_operand.hbm [shape: f32[4,16], index: 1, kind: input, shape index: {}]   ;;  %s985_s2 = inlined_call_operand.hbm [shape: f32[2,16,32], index: 2, kind: input, shape index: {}]   ;;  %s986_s3 = inlined_call_operand.hbm [shape: f32[2,4,16], index: 3, kind: output, shape index: {}]  }
   0x1   :  { %9 = vsyncpa [#allocation6], 0 }
   0x2   :  { %10 = vsyncpa [#allocation4], 0 }
   0x3   :  { %12 = vsyncpa [#allocation4 + $0x1], 0  ;;  %s780_s12 = smov 0   ;;  %s782_s13 = smov 0  }
   0x4   :  { %s784_s14 = smov 0   ;;  %s786_s15 = smov 0  }
   0x5 LB: > { %s801_s16 = sadd.s32 4294967295, %s748_s15   ;;  %s475_s17 = sadd.s32 4294967294, %s748_s15   ;;  %s748_s15 = sphi %s786_s15, %s1010_s15   ;;  %s744_s14 = sphi %s784_s14, %s1009_s14   ;;  %s740_s13 = sphi %s782_s13, %s1008_s13   ;;  %s736_s12 = sphi %s780_s12, %s1007_s12  }
   0x6   : > { %s805_s18 = sadd.s32 1, %s748_s15   ;;  %s67_s19 = sadd.s32 1, %s744_s14 }
   0x7   : > { %s64_s20 = ssub.s32 %s748_s15, %s805_s18  ;;  %p74_p0 = scmp.ne.s32.totalorder %s744_s14, %s740_s13 }
   0x8   : > { %p65_p1 = scmp.eq.s32.totalorder %s64_s20, 0  ;;  %p75_p2 = scmp.eq.s32.totalorder %s748_s15, 0 }
   0x9   : > { %p80_p3 = scmp.ne.s32.totalorder %s740_s13, %s736_s12  ;;  %p988_p4 = scmp.eq.s32.totalorder %s801_s16, 0 }
   0xa   : > { %s817_s21 = scalar_select %p65_p1, %s744_s14, %s67_s19  }
   0xb   : > { %p819_p5 = por %p75_p2, %p74_p0  ;;  %p825_p6 = por %p988_p4, %p80_p3 }
   0xc   : > { %p104_p7 = scmp.eq.s32.totalorder %s801_s16, 1  ;;  %p110_p8 = scmp.eq.s32.totalorder %s475_s17, 1 }
   0xd   : > { %s992_s23 = scalar_select %p825_p6, 1, 0 }
   0xe   : > { %p476_p9 = scmp.ge.s32.totalorder %s748_s15, 1  ;;  %p117_p10 = scmp.lt.s32.totalorder %s748_s15, 3 }
   0xf   : > { %p832_p11 = por %p104_p7, %p74_p0  ;;  %p836_p12 = por %p110_p8, %p80_p3 }
  0x10   : > { %p840_p13 = pnand %p476_p9, %p117_p10  ;;  %s750_s27 = smov [#allocation2]  }
  0x11   : > { %s993_s24 = scalar_select %p832_p11, 1, 0 }
  0x12   : > { %s994_s25 = scalar_select %p836_p12, 1, 0 }
  0x13   : > { %s995_s26 = scalar_select %p840_p13, 1, 0 }
  0x14   : > { %p526_p1 = pneg %p840_p13  ;;  %s129_s28 = sshll.u32 %s750_s27, 4  ;;  %s130_s28 = int_to_ptr.vmem [resolvable:$true] %s129_s28 }
  0x15   : > { %p543_p3 = scmp.lt.s32.totalorder %s748_s15, 2  ;;  %s751_s30 = smov [#allocation5]  }
  0x16   : > { %p848_p2 = pnand %p526_p1, %p988_p4  ;;  %s143_s4 = sshll.u32 %s751_s30, 4  ;;  %s144_s4 = int_to_ptr.vmem [resolvable:$true] %s143_s4 }
  0x17   : > { %s607_s5 = scalar_lea.vmem %s130_s28, 128  ;;  %p615_p12 = scmp.lt.s32.totalorder %s130_s28, %s130_s28 }
  0x18   : > { %p598_p7 = pneg %p848_p2  ;;  %p608_p8 = scmp.ne.s32.totalorder %s130_s28, %s607_s5 }
  0x19   : > { %p616_p11 = scmp.lt.s32.totalorder %s607_s5, %s607_s5 }
  0x1a   : > { %p610_p9 = pnand %p608_p8, %p598_p7 }
  0x1b   : > { %p617_p1 = por %p616_p11, %p615_p12 }
  0x1c   : > { %p611_p10 = pneg %p610_p9 }
  0x1e   : > { %p618_p4 = pnand %p617_p1, %p611_p10 }
  0x20   : > { %621 = shalt.err (!%p618_p4)
}
  0x21   : > { %s752_s6 = smov 64   ;;  %s753_s7 = smov 4  }
  0x22   : > { %529 = dma.hbm_to_vmem [thread:$0]  (!%p848_p2), %s983_s0, 128, %s130_s28, [#allocation3], %s752_s6, %s752_s6, %s753_s7  }
  0x23   : > { %p868_p8 = pnand %p543_p3, %p819_p5  ;;  %s633_s11 = scalar_lea.vmem %s144_s4, 64 }
  0x24   : > { %p634_p4 = scmp.ne.s32.totalorder %s144_s4, %s633_s11  ;;  %p641_p9 = scmp.lt.s32.totalorder %s144_s4, %s144_s4 }
  0x25   : > { %p642_p10 = scmp.lt.s32.totalorder %s633_s11, %s633_s11 }
  0x26   : > { %p636_p11 = pnand %p634_p4, %p598_p7 }
  0x27   : > { %p643_p1 = por %p642_p10, %p641_p9 }
  0x28   : > { %p637_p12 = pneg %p636_p11 }
  0x2a   : > { %p644_p0 = pnand %p643_p1, %p637_p12 }
  0x2c   : > { %647 = shalt.err (!%p644_p0)
}
  0x2d   : > { %532 = dma.hbm_to_vmem [thread:$0]  (!%p848_p2), %s984_s1, 64, %s144_s4, [#allocation6]  }
  0x2e   : > { %s154_s20 = sand.u32 1, %s748_s15   ;;  %s156_s22 = sand.u32 1, %s744_s14  }
  0x2f   : > { %s480_s27 = sshll.u32 %s156_s22, 4  ;;  %s495_s28 = sshll.u32 %s748_s15, 8 }
  0x30   : > { %s886_s6 = scalar_lea.hbm %s985_s2, %s495_s28  ;;  %s158_s29 = scalar_lea.vmem [#allocation7], %s480_s27 }
  0x31   : > { %s165_s7 = sshll.u32 %s158_s29, 4  ;;  %s890_s8 = scalar_lea.sflag [#allocation3], %s154_s20  ;;  %s888_s7 = int_to_ptr.vmem [resolvable:$true] %s165_s7 }
  0x32   : > { %s648_s9 = scalar_lea.hbm %s886_s6, 256  ;;  %p650_p2 = pneg %p868_p8 }
  0x33   : > { %p649_p5 = scmp.ne.s32.totalorder %s886_s6, %s648_s9  ;;  %s653_s17 = scalar_lea.hbm %s985_s2, 512 }
  0x34   : > { %p654_p7 = scmp.lt.s32.totalorder %s886_s6, %s985_s2  ;;  %p655_p4 = scmp.lt.s32.totalorder %s653_s17, %s648_s9 }
  0x35   : > { %p651_p0 = pnand %p650_p2, %p649_p5 }
  0x36   : > { %p656_p11 = por %p655_p4, %p654_p7 }
  0x37   : > { %p652_p3 = pneg %p651_p0 }
  0x39   : > { %p657_p12 = pnand %p656_p11, %p652_p3 }
  0x3b   : > { %660 = shalt.err (!%p657_p12)
}
  0x3c   : > { %s661_s20 = scalar_lea.vmem %s888_s7, 256  ;;  %s754_s27 = smov [#allocation7]  }
  0x3d   : > { %p662_p9 = scmp.ne.s32.totalorder %s888_s7, %s661_s20  ;;  %s666_s28 = sshll.u32 %s754_s27, 4  ;;  %s667_s28 = int_to_ptr.vmem [resolvable:$false] %s666_s28 }
  0x3e   : > { %s668_s30 = scalar_lea.vmem %s667_s28, 512  ;;  %p669_p5 = scmp.lt.s32.totalorder %s888_s7, %s667_s28 }
  0x3f   : > { %p664_p10 = pnand %p662_p9, %p650_p2  ;;  %p670_p0 = scmp.lt.s32.totalorder %s668_s30, %s661_s20 }
  0x41   : > { %p665_p1 = pneg %p664_p10  ;;  %p671_p6 = por %p670_p0, %p669_p5 }
  0x43   : > { %p672_p13 = pnand %p671_p6, %p665_p1 }
  0x45   : > { %675 = shalt.err (!%p672_p13)
}
  0x46   : > { %s755_s5 = smov 128   ;;  %s756_s29 = smov 8  }
  0x47   : > { %536 = dma.hbm_to_vmem [thread:$0]  (!%p868_p8), %s886_s6, 256, %s888_s7, %s890_s8, %s755_s5, %s755_s5, %s756_s29  }
  0x48   : > { %p998_p2 = scmp.ne.s32.totalorder %s995_s26, 0 }
  0x49   : > { %p999_p3 = scmp.eq.s32.totalorder (!%p998_p2), %s801_s16, 0 }
  0x4a   : > { %177 = sbr.rel (%p998_p2) target bundleno = 820 (0x334), region = 32 }
  0x4f   : > { %719 = dma.done.wait (%p999_p3), [#allocation3], 128   ;;  %p1000_p7 = pmov %p999_p3 }
  0x50   : > { %p1001_p6 = pmov %p999_p3 }
  0x51   : > { %721 = vsyncadd (%p1000_p7), [#allocation3], 4294967168 }
  0x52   : > { %723 = dma.done.wait (%p1001_p6), [#allocation6], 64   ;;  %p1002_p13 = pmov %p999_p3 }
  0x53   : > { %s187_s10 = sand.u32 1, %s801_s16   ;;  %s923_s6 = sand.u32 1, %s740_s13  }
  0x54   : > { %725 = vsyncadd (%p1002_p13), [#allocation6], 4294967232  ;;  %s486_s26 = sshll.u32 %s923_s6, 4  ;;  %s188_s7 = scalar_lea.sflag [#allocation3], %s187_s10 }
  0x55   : > { %s191_s8 = scalar_lea.vmem [#allocation7], %s486_s26  ;;  %p1003_p8 = scmp.ne.s32.totalorder %s992_s23, 0 }
  0x57   : > { %727 = dma.done.wait (%p1003_p8), %s188_s7, 256  }
  0x58   : > { %729 = vsyncadd (%p1003_p8), %s188_s7, 4294967040  ;;  %v757_v0 = vmov 0.0   ;;  %vm758_vm0 = vmmov 0   ;;  %v215_v1 = vld [vmem:[%s191_s8] sm:$0xff]  ;;  %v216_v2 = vld [vmem:[%s191_s8 + $0x8] sm:$0xff]  ;;  %vm225_vm1 = vcmask 261120  }
  0x59   : > { %501 = vmatprep.subr.bf16.mxu0 %v757_v0  ;;  %503 = vmatprep.mubr.msk.bf16.mxu0 %vm758_vm0, %v757_v0  ;;  %v217_v3 = vpack.c.bf16 %v216_v2, %v215_v1  ;;  %v587_v5 = vld [vmem:[#allocation2] sm:$0xff]   ;;  %vm273_vm2 = vcmask 130048   ;;  %v296_v28 = vld [vmem:[#allocation5] sm:$0xf]  ;;  %s487_s23 = sshll.u32 %s923_s6, 2  ;;  %s492_s9 = sshll.u32 %s801_s16, 6 }
  0x5a   : > { %507 = vmatprep.subr.mxu1 %v757_v0  ;;  %511 = vmatprep.mubr.msk.f32.mxu1 %vm758_vm0, %v757_v0  ;;  %s213_s4 = scalar_lea.vmem [#allocation8], %s487_s23  ;;  %vm370_vm3 = vcmask 125952   ;;  %s940_s22 = scalar_lea.hbm %s986_s3, %s492_s9 }
  0x5b   : > { %v230_v4 = vsel %vm225_vm1, %v217_v3, 0  ;;  %s386_s11 = sshll.u32 %s213_s4, 4  ;;  %s373_s20 = scalar_lea.sflag [#allocation4], %s923_s6  ;;  %s942_s11 = int_to_ptr.vmem [resolvable:$true] %s386_s11 }
  0x5c   : > { %502 = vmatpush3.bf16.xpose.msra.mxu0 %v230_v4  ;;  %s676_s27 = scalar_lea.vmem %s942_s11, 64  ;;  %p1004_p11 = scmp.ne.s32.totalorder %s993_s24, 0 }
  0x5d   : > { %p677_p4 = scmp.ne.s32.totalorder %s942_s11, %s676_s27  ;;  %s759_s16 = smov [#allocation8]  }
  0x5e   : > { %s680_s28 = sshll.u32 %s759_s16, 4  ;;  %s681_s28 = int_to_ptr.vmem [resolvable:$false] %s680_s28 }
  0x5f   : > { %p678_p12 = pnand %p677_p4, %p1004_p11  ;;  %s682_s30 = scalar_lea.vmem %s681_s28, 128 }
  0x60   : > { %p683_p10 = scmp.lt.s32.totalorder %s942_s11, %s681_s28  ;;  %p684_p1 = scmp.lt.s32.totalorder %s682_s30, %s676_s27 }
  0x61   : > { %p679_p9 = pneg %p678_p12 }
  0x62   : > { %p685_p5 = por %p684_p1, %p683_p10 }
  0x63   : > { %504 = vmatmul.mubr.msk.bf16.vlgmr.msra.gmra.mxu0 %vm225_vm1, %v587_v5 }
  0x64   : > { %p686_p0 = pnand %p685_p5, %p679_p9 }
 0x123   : > { %v266_v6 = vpop.f32.mrf.mxu0 }
 0x124   : > { %v274_v11 = vsel %vm273_vm2, %v266_v6, -inf }
 0x125   : > { %v505_v7 = vpop.f32.mrf.mxu0 }
 0x127   : > { %v269_v8 = vpop.f32.mrf.mxu0 }
 0x128   : > { %v277_v9 = vsel %vm273_vm2, %v269_v8, -inf }
 0x129   : > { %278 = vmax.xlane.f32.xlu0 %v277_v9  ;;  %v506_v10 = vpop.f32.mrf.mxu0 }
 0x12d   : > { %275 = vmax.xlane.f32.xlu0 %v274_v11 }
 0x1b2   : > { %v279_v12 = vpop.xlane.xlu0 %278 }
 0x1b3   : > { %v281_v13 = vsub.f32 %v269_v8, %v279_v12 }
 0x1b5   : > { %v284_v14 = vmul.f32 1.442695, %v281_v13 }
 0x1b6   : > { %v276_v15 = vpop.xlane.xlu0 %275 }
 0x1b7   : > { %588 = vpow2.f32 %v284_v14  ;;  %v280_v16 = vsub.f32 %v266_v6, %v276_v15 }
 0x1b9   : > { %v282_v17 = vmul.f32 1.442695, %v280_v16 }
 0x1bb   : > { %590 = vpow2.f32 %v282_v17 }
 0x1c4   : > { %v589_v18 = vpop.eup %588 }
 0x1c5   : > { %v289_v19 = vsel %vm273_vm2, %v589_v18, 0.0 }
 0x1c6   : > { %290 = vadd.xlane.f32.xlu1 %v289_v19 }
 0x1c8   : > { %v591_v20 = vpop.eup %590 }
 0x1c9   : > { %v286_v21 = vsel %vm273_vm2, %v591_v20, 0.0 }
 0x1ca   : > { %287 = vadd.xlane.f32.xlu1 %v286_v21 }
 0x24f   : > { %v291_v22 = vpop.xlane.xlu1 %290 }
 0x250   : > { %592 = vrcp.f32 %v291_v22 }
 0x253   : > { %v288_v23 = vpop.xlane.xlu1 %287 }
 0x254   : > { %594 = vrcp.f32 %v288_v23 }
 0x25d   : > { %v593_v24 = vpop.eup %592 }
 0x25e   : > { %v295_v25 = vmul.f32 %v593_v24, %v589_v18 }
 0x260   : > { %508 = vmatpush3.msra.mxu1 %v295_v25 }
 0x261   : > { %v595_v26 = vpop.eup %594  ;;  %509 = vmatprep.subr.mxu1 %v757_v0 }
 0x262   : > { %v294_v27 = vmul.f32 %v595_v26, %v591_v20 }
 0x264   : > { %510 = vmatpush3.msra.mxu1 %v294_v27 }
 0x265   : > { %512 = vmatmul.mubr.msk.f32.vlgmr.msra.gmra.mxu1 %vm273_vm2, %v296_v28 }
 0x325   : > { %v366_v29 = vpop.f32.mrf.mxu1 }
 0x326   : > { %371 = vst.msk [vmem:[%s213_s4] sm:$0xf] %vm370_vm3, %v366_v29 }
 0x327   : > { %v513_v30 = vpop.f32.mrf.mxu1 }
 0x328   : > { %689 = shalt.err (!%p686_p0)
}
 0x329   : > { %s690_s5 = scalar_lea.hbm %s940_s22, 64  ;;  %s694_s6 = scalar_lea.hbm %s986_s3, 128 }
 0x32a   : > { %p691_p2 = scmp.ne.s32.totalorder %s940_s22, %s690_s5  ;;  %p695_p6 = scmp.lt.s32.totalorder %s940_s22, %s986_s3 }
 0x32b   : > { %p696_p13 = scmp.lt.s32.totalorder %s694_s6, %s690_s5 }
 0x32c   : > { %p692_p3 = pnand %p691_p2, %p1004_p11 }
 0x32d   : > { %p697_p8 = por %p696_p13, %p695_p6 }
 0x32e   : > { %p693_p7 = pneg %p692_p3 }
 0x330   : > { %p698_p4 = pnand %p697_p8, %p693_p7 }
 0x332   : > { %701 = shalt.err (!%p698_p4)
}
 0x333   : > { %524 = dma.vmem_to_hbm [thread:$0]  (%p1004_p11), %s942_s11, 64, %s940_s22, %s373_s20  }
 0x334 PF: > { %s398_s8 = sand.u32 1, %s736_s12   ;;  %p1005_p12 = scmp.ne.s32.totalorder %s994_s25, 0 }
 0x335   : > { %p1006_p9 = scmp.ge.s32.totalorder %s748_s15, 2  ;;  %s399_s23 = scalar_lea.sflag [#allocation4], %s398_s8 }
 0x337   : > { %p538_p10 = pnand %p1006_p9, %p1005_p12 }
 0x339   : > { %p539_p1 = pneg %p538_p10 }
 0x33b   : > { %731 = dma.done.wait (%p539_p1), %s399_s23, 64  }
 0x33c   : > { %733 = vsyncadd (%p539_p1), %s399_s23, 4294967232  ;;  %p15_p5 = scmp.ge.s32.totalorder %s805_s18, 4   ;;  %s1007_s12 = smov %s740_s13 }
 0x33d   : > { %s1008_s13 = smov %s744_s14  ;;  %s1009_s14 = smov %s817_s21 }
 0x33e   : > { %s1010_s15 = smov %s805_s18  ;;  %17 = sbr.rel (!%p15_p5) target bundleno = 5 (0x5), region = 84 }
 0x343   :  { %404 = vsyncpa [#allocation3], 1 }
 0x344   :  { %406 = vsyncpa [#allocation3 + $0x1], 1 }
 0x345   :  { %407 = vsyncpa [#allocation6], 1 }
 0x346   :  { %408 = vsyncpa [#allocation4], 1 }
 0x347   :  { %410 = vsyncpa [#allocation4 + $0x1], 1 }

</bundles_post_ra>
